<compile_context>
chip_gen: v7x
topology: tpu7x:2x2x1
jax: 0.10.0
libtpu: 0.0.40
codegen_flags: <defaults>
</compile_context>

<pallas_src>
import functools

import jax
import jax.numpy as jnp
from jax.experimental import pallas as pl
from jax.experimental.pallas import tpu as pltpu

N_FILTERS = 2
KSIZE = 5
N_HL = 10
LN_EPS = 1e-5


# --------------------------------------------------------------------------
# Kernel: one batch tile (TB samples, batch on lanes after the conv matmul)
# per grid step.
# --------------------------------------------------------------------------
def cnn_forward_kernel(x_ref, t_ref, lnw_ref, lnb_ref,
                       h1w_ref, h1b_ref, h2w_ref, h2b_ref, out_ref,
                       *, batch, tile_b, ragged):
    # x_ref:   (TB, C*W)   batch tile in natural layout (no wrapper transpose)
    # t_ref:   (F*W, C*W)  banded Toeplitz conv weights (conv + flatten fused)
    # lnw/lnb: (F*W, 1)    LayerNorm affine (row-major over (F, W))
    # h1w:     (N_HL, F*W) h1b: (N_HL, 1)
    # h2w:     (N_HL, 1)   h2b: (1, 1)
    # out_ref: (1, TB)     lane-dense logits tile
    x = x_ref[...].astype(jnp.float32)                       # (TB, CW)

    # ---- Conv1d + flatten: single MXU matmul, contracting the feature axis
    #      of BOTH operands so the result is batch-on-lanes: (FW, TB). ----
    conv = jax.lax.dot_general(
        t_ref[...].astype(jnp.float32), x,
        dimension_numbers=(((1,), (1,)), ((), ())),
        preferred_element_type=jnp.float32)                  # (FW, TB)

    if ragged:
        # Zero out lanes belonging to out-of-range batch rows (the input DMA
        # of the last tile is clipped; those lanes contain garbage).
        lane = (pl.program_id(0) * tile_b
                + jax.lax.broadcasted_iota(jnp.int32, (1, tile_b), 1))
        conv = jnp.where(lane < batch, conv, 0.0)

    # ---- LayerNorm over (F, W) per sample: fused single-pass stats ----
    fw = conv.shape[0]
    inv_n = jnp.float32(1.0 / fw)
    s = jnp.sum(conv, axis=0, keepdims=True)                 # (1, TB)
    sq = jnp.sum(conv * conv, axis=0, keepdims=True)         # (1, TB)
    mean = s * inv_n
    var = sq * inv_n - mean * mean                           # biased, like torch LN
    inv_std = jax.lax.rsqrt(var + LN_EPS)

    y = (conv - mean) * inv_std * lnw_ref[...] + lnb_ref[...]
    y = jnp.maximum(y, 0.0)                                  # ReLU, (FW, TB)

    # ---- h1: Linear(F*W -> N_HL) + ReLU, batch on lanes ----
    h1 = jnp.dot(h1w_ref[...], y,
                 preferred_element_type=jnp.float32) + h1b_ref[...]
    h1 = jnp.maximum(h1, 0.0)                                # (N_HL, TB)

    # ---- h2: Linear(N_HL -> 1) as broadcast-mul + sublane reduce (VPU/XLU) ----
    logits = jnp.sum(h1 * h2w_ref[...], axis=0, keepdims=True) + h2b_ref[...]
    out_ref[...] = logits                                    # (1, TB) lane-dense


# --------------------------------------------------------------------------
# Wrapper-side weight prep: banded Toeplitz for Conv1d('same', no bias).
#   T[f*W + i, c*W + j] = wconv[f, c, k]  where j = i + k - pad, 0 <= j < W
# --------------------------------------------------------------------------
def build_toeplitz(wconv, in_channels, winsize):
    F, C, K = wconv.shape
    assert C == in_channels and K == KSIZE
    pad = (K - 1) // 2
    w_out = jnp.arange(winsize)[None, :, None]               # (1, W, 1)
    w_in = jnp.arange(winsize)[None, None, :]                # (1, 1, W)
    k = jnp.arange(K)[:, None, None]                         # (K, 1, 1)
    sel = (w_in == w_out + k - pad).astype(jnp.float32)      # (K, W, W)
    band = jnp.einsum("fck,kij->fcij", wconv.astype(jnp.float32), sel)
    return band.transpose(0, 2, 1, 3).reshape(F * winsize, C * winsize)


@functools.partial(jax.jit, static_argnames=("tb",))
def cnn_forward(x, params, tb=8192):
    B, C, W = x.shape
    CW, FW = C * W, N_FILTERS * W

    # ---- static batch-tile selection ----
    # Cap so one x buffer is <= ~2 MiB (double-buffered 4 MiB: comfortable on
    # all of v5e / v6e / v7x).
    tb_vmem = max(128, ((2 * 1024 * 1024) // (CW * 4)) // 128 * 128)
    tile_b = min(tb, tb_vmem)
    if B <= 128:
        tile_b = B                      # one full-batch tile, no padding at all
    else:
        # keep >= 2 grid steps when the batch allows it (v7x: 2 TensorCores)
        half = pl.cdiv(pl.cdiv(B, 2), 128) * 128
        tile_b = max(128, min(tile_b, half))
    n_tiles = pl.cdiv(B, tile_b)
    b_pad = n_tiles * tile_b
    ragged = (b_pad != B)

    # x stays in its natural (B, C*W) layout -- no wrapper-side transpose or
    # pad (both would be an extra full HBM pass over the input).  dtype is
    # passed through (bf16 callers stream half the bytes; cast is in-kernel).
    x_flat = x.reshape(B, CW)

    t_mat = build_toeplitz(params["wconv"], C, W)             # (FW, CW)
    lnw = params["ln_w"].reshape(FW, 1)
    lnb = params["ln_b"].reshape(FW, 1)
    h1w = params["h1_w"].astype(jnp.float32)                  # (N_HL, FW)
    h1b = params["h1_b"].reshape(N_HL, 1)
    h2w = params["h2_w"].reshape(N_HL, 1)
    h2b = params["h2_b"].reshape(1, 1)

    vmem = pltpu.MemorySpace.VMEM
    full = lambda shape: pl.BlockSpec(shape, lambda i: (0, 0), memory_space=vmem)

    kernel = functools.partial(cnn_forward_kernel,
                               batch=B, tile_b=tile_b, ragged=ragged)

    out = pl.pallas_call(
        kernel,
        out_shape=jax.ShapeDtypeStruct((1, b_pad), jnp.float32),
        grid=(n_tiles,),
        in_specs=[
            pl.BlockSpec((tile_b, CW), lambda i: (i, 0), memory_space=vmem),  # x
            full((FW, CW)),                                   # fused conv Toeplitz
            full((FW, 1)), full((FW, 1)),                     # ln_w, ln_b
            full((N_HL, FW)),                                 # h1_w
            full((N_HL, 1)),                                  # h1_b
            full((N_HL, 1)),                                  # h2_w
            full((1, 1)),                                     # h2_b
        ],
        out_specs=pl.BlockSpec((1, tile_b), lambda i: (0, i), memory_space=vmem),
        compiler_params=pltpu.CompilerParams(
            dimension_semantics=("parallel",),
            vmem_limit_bytes=32 * 1024 * 1024),
    )(x_flat, t_mat, lnw, lnb, h1w, h1b, h2w, h2b)

    return out[0, :B].reshape(B, 1)                           # back to (B, 1)


# --------------------------------------------------------------------------
# Pure-JAX reference (for correctness check) and synthetic params.
# --------------------------------------------------------------------------
def cnn_reference(x, params):
    B, C, W = x.shape
    pad = (KSIZE - 1) // 2
    xp = jnp.pad(x.astype(jnp.float32), ((0, 0), (0, 0), (pad, pad)))
    conv = jnp.zeros((B, N_FILTERS, W), jnp.float32)
    for f in range(N_FILTERS):
        for c in range(C):
            for k in range(KSIZE):
                conv = conv.at[:, f, :].add(params["wconv"][f, c, k] * xp[:, c, k:k + W])
    mean = conv.reshape(B, -1).mean(axis=1).reshape(B, 1, 1)
    var = ((conv - mean) ** 2).reshape(B, -1).mean(axis=1).reshape(B, 1, 1)
    y = (conv - mean) / jnp.sqrt(var + LN_EPS) * params["ln_w"][None] + params["ln_b"][None]
    y = jnp.maximum(y, 0.0).reshape(B, -1)
    h1 = jnp.maximum(y @ params["h1_w"].T + params["h1_b"], 0.0)
    return h1 @ params["h2_w"].T + params["h2_b"]


def init_params(key, in_channels, winsize):
    k0, k1, k2, k3, k4 = jax.random.split(key, 5)
    fan_c = in_channels * KSIZE
    fan_1 = N_FILTERS * winsize
    u = lambda k, shape, fan: jax.random.uniform(
        k, shape, jnp.float32, -1.0, 1.0) / jnp.sqrt(jnp.float32(fan))
    return {
        "wconv": u(k0, (N_FILTERS, in_channels, KSIZE), fan_c),
        "ln_w": jnp.ones((N_FILTERS, winsize), jnp.float32),
        "ln_b": jnp.zeros((N_FILTERS, winsize), jnp.float32),
        "h1_w": u(k1, (N_HL, fan_1), fan_1),
        "h1_b": u(k2, (N_HL,), fan_1),
        "h2_w": u(k3, (1, N_HL), N_HL),
        "h2_b": u(k4, (1,), N_HL),
    }


if __name__ == "__main__":
    in_channels, winsize = 4, 16
    key = jax.random.PRNGKey(0)
    kx, kx2, kp = jax.random.split(key, 3)
    params = init_params(kp, in_channels, winsize)

    # Small batch (single full-batch tile path).
    x = jax.random.normal(kx, (8, in_channels, winsize), jnp.float32)
    logits = cnn_forward(x, params)
    jax.block_until_ready(logits)
    assert logits.shape == (8, 1)
    ref = cnn_reference(x, params)
    assert jnp.allclose(logits, ref, rtol=2e-3, atol=2e-3), "mismatch (small batch)"

    # Larger, non-aligned batch (multi-step parallel grid + ragged last tile).
    x2 = jax.random.normal(kx2, (300, in_channels, winsize), jnp.float32)
    logits2 = cnn_forward(x2, params)
    jax.block_until_ready(logits2)
    assert logits2.shape == (300, 1)
    ref2 = cnn_reference(x2, params)
    assert jnp.allclose(logits2, ref2, rtol=2e-3, atol=2e-3), "mismatch (ragged batch)"

    print("KERNEL_OK")
</pallas_src>

<mosaic_0001>
module attributes {stable_mosaic.version = 11 : i64} {
  func.func @cnn_forward_kernel(%arg0: i32, %arg1: memref<8x64xf32, #tpu.memory_space<vmem>>, %arg2: memref<32x64xf32, #tpu.memory_space<vmem>>, %arg3: memref<32x1xf32, #tpu.memory_space<vmem>>, %arg4: memref<32x1xf32, #tpu.memory_space<vmem>>, %arg5: memref<10x32xf32, #tpu.memory_space<vmem>>, %arg6: memref<10x1xf32, #tpu.memory_space<vmem>>, %arg7: memref<10x1xf32, #tpu.memory_space<vmem>>, %arg8: memref<1x1xf32, #tpu.memory_space<vmem>>, %arg9: memref<1x8xf32, #tpu.memory_space<vmem>>) attributes {dimension_semantics = [#tpu.dimension_semantics<parallel>], iteration_bounds = array<i64: 1>, scalar_prefetch = 0 : i64, scratch_operands = 0 : i64, tpu.core_type = #tpu.core_type<tc>, window_params = [{transform_indices = @transform_0, window_bounds = array<i64: 8, 64>}, {pipeline_mode = #tpu.pipeline_mode<synchronous>, transform_indices = @transform_1, window_bounds = array<i64: 32, 64>}, {pipeline_mode = #tpu.pipeline_mode<synchronous>, transform_indices = @transform_2, window_bounds = array<i64: 32, 1>}, {pipeline_mode = #tpu.pipeline_mode<synchronous>, transform_indices = @transform_3, window_bounds = array<i64: 32, 1>}, {pipeline_mode = #tpu.pipeline_mode<synchronous>, transform_indices = @transform_4, window_bounds = array<i64: 10, 32>}, {pipeline_mode = #tpu.pipeline_mode<synchronous>, transform_indices = @transform_5, window_bounds = array<i64: 10, 1>}, {pipeline_mode = #tpu.pipeline_mode<synchronous>, transform_indices = @transform_6, window_bounds = array<i64: 10, 1>}, {pipeline_mode = #tpu.pipeline_mode<synchronous>, transform_indices = @transform_7, window_bounds = array<i64: 1, 1>}, {transform_indices = @transform_8, window_bounds = array<i64: 1, 8>}]} {
    %c0 = arith.constant 0 : index
    %c0_0 = arith.constant 0 : index
    %0 = vector.load %arg1[%c0, %c0_0] : memref<8x64xf32, #tpu.memory_space<vmem>>, vector<8x64xf32>
    %c0_1 = arith.constant 0 : index
    %c0_2 = arith.constant 0 : index
    %1 = vector.load %arg2[%c0_1, %c0_2] : memref<32x64xf32, #tpu.memory_space<vmem>>, vector<32x64xf32>
    %cst = arith.constant dense<0.000000e+00> : vector<32x8xf32>
    %2 = tpu.matmul %1, %0, %cst {dimension_numbers = #tpu.dot_dimension_numbers<[1], [1], [0], [0], [0, 0, 1, 0], [], []>} : vector<32x64xf32>, vector<8x64xf32>, vector<32x8xf32> -> vector<32x8xf32>
    %cst_3 = arith.constant dense<0.000000e+00> : vector<8xf32>
    %3 = vector.multi_reduction <add>, %2, %cst_3 [0] : vector<32x8xf32> to vector<8xf32>
    %4 = vector.shape_cast %3 : vector<8xf32> to vector<1x8xf32>
    %5 = arith.mulf %2, %2 : vector<32x8xf32>
    %cst_4 = arith.constant dense<0.000000e+00> : vector<8xf32>
    %6 = vector.multi_reduction <add>, %5, %cst_4 [0] : vector<32x8xf32> to vector<8xf32>
    %7 = vector.shape_cast %6 : vector<8xf32> to vector<1x8xf32>
    %cst_5 = arith.constant 3.125000e-02 : f32
    %8 = vector.broadcast %cst_5 : f32 to vector<1x8xf32>
    %9 = arith.mulf %4, %8 : vector<1x8xf32>
    %cst_6 = arith.constant 3.125000e-02 : f32
    %10 = vector.broadcast %cst_6 : f32 to vector<1x8xf32>
    %11 = arith.mulf %7, %10 : vector<1x8xf32>
    %12 = arith.mulf %9, %9 : vector<1x8xf32>
    %13 = arith.subf %11, %12 : vector<1x8xf32>
    %cst_7 = arith.constant 9.99999974E-6 : f32
    %14 = vector.broadcast %cst_7 : f32 to vector<1x8xf32>
    %15 = arith.addf %13, %14 : vector<1x8xf32>
    %16 = math.rsqrt %15 : vector<1x8xf32>
    %17 = vector.broadcast %9 : vector<1x8xf32> to vector<32x8xf32>
    %18 = arith.subf %2, %17 : vector<32x8xf32>
    %19 = vector.broadcast %16 : vector<1x8xf32> to vector<32x8xf32>
    %20 = arith.mulf %18, %19 : vector<32x8xf32>
    %c0_8 = arith.constant 0 : index
    %c0_9 = arith.constant 0 : index
    %21 = vector.load %arg3[%c0_8, %c0_9] : memref<32x1xf32, #tpu.memory_space<vmem>>, vector<32x1xf32>
    %22 = vector.broadcast %21 : vector<32x1xf32> to vector<32x8xf32>
    %23 = arith.mulf %20, %22 : vector<32x8xf32>
    %c0_10 = arith.constant 0 : index
    %c0_11 = arith.constant 0 : index
    %24 = vector.load %arg4[%c0_10, %c0_11] : memref<32x1xf32, #tpu.memory_space<vmem>>, vector<32x1xf32>
    %25 = vector.broadcast %24 : vector<32x1xf32> to vector<32x8xf32>
    %26 = arith.addf %23, %25 : vector<32x8xf32>
    %cst_12 = arith.constant 0.000000e+00 : f32
    %27 = vector.broadcast %cst_12 : f32 to vector<32x8xf32>
    %28 = arith.maximumf %26, %27 : vector<32x8xf32>
    %c0_13 = arith.constant 0 : index
    %c0_14 = arith.constant 0 : index
    %29 = vector.load %arg5[%c0_13, %c0_14] : memref<10x32xf32, #tpu.memory_space<vmem>>, vector<10x32xf32>
    %cst_15 = arith.constant dense<0.000000e+00> : vector<10x8xf32>
    %30 = tpu.matmul %29, %28, %cst_15 {dimension_numbers = #tpu.dot_dimension_numbers<[1], [0], [0], [1], [0, 0, 1, 1], [], []>} : vector<10x32xf32>, vector<32x8xf32>, vector<10x8xf32> -> vector<10x8xf32>
    %c0_16 = arith.constant 0 : index
    %c0_17 = arith.constant 0 : index
    %31 = vector.load %arg6[%c0_16, %c0_17] : memref<10x1xf32, #tpu.memory_space<vmem>>, vector<10x1xf32>
    %32 = vector.broadcast %31 : vector<10x1xf32> to vector<10x8xf32>
    %33 = arith.addf %30, %32 : vector<10x8xf32>
    %cst_18 = arith.constant 0.000000e+00 : f32
    %34 = vector.broadcast %cst_18 : f32 to vector<10x8xf32>
    %35 = arith.maximumf %33, %34 : vector<10x8xf32>
    %c0_19 = arith.constant 0 : index
    %c0_20 = arith.constant 0 : index
    %36 = vector.load %arg7[%c0_19, %c0_20] : memref<10x1xf32, #tpu.memory_space<vmem>>, vector<10x1xf32>
    %37 = vector.broadcast %36 : vector<10x1xf32> to vector<10x8xf32>
    %38 = arith.mulf %35, %37 : vector<10x8xf32>
    %cst_21 = arith.constant dense<0.000000e+00> : vector<8xf32>
    %39 = vector.multi_reduction <add>, %38, %cst_21 [0] : vector<10x8xf32> to vector<8xf32>
    %40 = vector.shape_cast %39 : vector<8xf32> to vector<1x8xf32>
    %c0_22 = arith.constant 0 : index
    %c0_23 = arith.constant 0 : index
    %41 = vector.load %arg8[%c0_22, %c0_23] : memref<1x1xf32, #tpu.memory_space<vmem>>, vector<1x1xf32>
    %42 = vector.broadcast %41 : vector<1x1xf32> to vector<1x8xf32>
    %43 = arith.addf %40, %42 : vector<1x8xf32>
    %c0_24 = arith.constant 0 : index
    %c0_25 = arith.constant 0 : index
    %44 = vector.load %arg9[%c0_24, %c0_25] : memref<1x8xf32, #tpu.memory_space<vmem>>, vector<1x8xf32>
    tpu.vector_store %arg9[%c0_24, %c0_25], %43 {strides = array<i32>} : memref<1x8xf32, #tpu.memory_space<vmem>>, vector<1x8xf32>,
    return
  }
  func.func @transform_0(%arg0: i32) -> (i32, i32) {
    %c0_i32 = arith.constant 0 : i32
    %c0_i32_0 = arith.constant 0 : i32
    return %arg0, %c0_i32 : i32, i32
  }
  func.func @transform_1(%arg0: i32) -> (i32, i32) {
    %c0_i32 = arith.constant 0 : i32
    %c0_i32_0 = arith.constant 0 : i32
    %c0_i32_1 = arith.constant 0 : i32
    return %c0_i32, %c0_i32_0 : i32, i32
  }
  func.func @transform_2(%arg0: i32) -> (i32, i32) {
    %c0_i32 = arith.constant 0 : i32
    %c0_i32_0 = arith.constant 0 : i32
    %c0_i32_1 = arith.constant 0 : i32
    return %c0_i32, %c0_i32_0 : i32, i32
  }
  func.func @transform_3(%arg0: i32) -> (i32, i32) {
    %c0_i32 = arith.constant 0 : i32
    %c0_i32_0 = arith.constant 0 : i32
    %c0_i32_1 = arith.constant 0 : i32
    return %c0_i32, %c0_i32_0 : i32, i32
  }
  func.func @transform_4(%arg0: i32) -> (i32, i32) {
    %c0_i32 = arith.constant 0 : i32
    %c0_i32_0 = arith.constant 0 : i32
    %c0_i32_1 = arith.constant 0 : i32
    return %c0_i32, %c0_i32_0 : i32, i32
  }
  func.func @transform_5(%arg0: i32) -> (i32, i32) {
    %c0_i32 = arith.constant 0 : i32
    %c0_i32_0 = arith.constant 0 : i32
    %c0_i32_1 = arith.constant 0 : i32
    return %c0_i32, %c0_i32_0 : i32, i32
  }
  func.func @transform_6(%arg0: i32) -> (i32, i32) {
    %c0_i32 = arith.constant 0 : i32
    %c0_i32_0 = arith.constant 0 : i32
    %c0_i32_1 = arith.constant 0 : i32
    return %c0_i32, %c0_i32_0 : i32, i32
  }
  func.func @transform_7(%arg0: i32) -> (i32, i32) {
    %c0_i32 = arith.constant 0 : i32
    %c0_i32_0 = arith.constant 0 : i32
    %c0_i32_1 = arith.constant 0 : i32
    return %c0_i32, %c0_i32_0 : i32, i32
  }
  func.func @transform_8(%arg0: i32) -> (i32, i32) {
    %c0_i32 = arith.constant 0 : i32
    %c0_i32_0 = arith.constant 0 : i32
    return %c0_i32, %arg0 : i32, i32
  }
}

</mosaic_0001>

<bundles_post_ra>
// kernel: cnn_forward.1
= control target key start
LH: loop header
LB: loop body
LE: loop exit
PB: predicated region body
PF: predicated region fallthrough
CT: control target
= control target key end

     0   :  { %s603_s0 = inlined_call_operand.vmem [shape: f32[8,64], index: 0, kind: input, shape index: {}]   ;;  %s604_s1 = inlined_call_operand.vmem [shape: f32[32,64], index: 1, kind: input, shape index: {}]   ;;  %s605_s2 = inlined_call_operand.vmem [shape: f32[32,1], index: 2, kind: input, shape index: {}]   ;;  %s606_s3 = inlined_call_operand.vmem [shape: f32[32,1], index: 3, kind: input, shape index: {}]   ;;  %s607_s4 = inlined_call_operand.vmem [shape: f32[10,32], index: 4, kind: input, shape index: {}]   ;;  %s608_s5 = inlined_call_operand.vmem [shape: f32[10,1], index: 5, kind: input, shape index: {}]   ;;  %s609_s6 = inlined_call_operand.vmem [shape: f32[10,1], index: 6, kind: input, shape index: {}]   ;;  %s610_s7 = inlined_call_operand.<no memory space> [shape: f32[1,1], index: 7, kind: input, shape index: {}]   ;;  %s611_s8 = inlined_call_operand.hbm [shape: f32[1,8], index: 8, kind: output, shape index: {}]  }
   0x1   :  { %v13_v0 = vstv %s610_s7 }
   0x2   :  { %14 = vst [vmem:[#allocation2] sm:$0x1] %v13_v0 }
   0x3   :  { %v32_v1 = vld [vmem:[%s603_s0] sm:$0xff]  ;;  %vm37_vm0 = vcmask 523264   ;;  %v34_v4 = vld [vmem:[%s604_s1 + $0x8] sm:$0xff]  ;;  %v467_v5 = vmov 0   ;;  %v35_v7 = vld [vmem:[%s604_s1 + $0x10] sm:$0xff] }
   0x4   :  { %v33_v2 = vld [vmem:[%s604_s1] sm:$0xff]  ;;  %410 = vmatprep.subr.msk.mxu0 %vm37_vm0, %v32_v1  ;;  %439 = vset.pattern.permute.xlu0 %v467_v5  ;;  %v184_v8 = vld [vmem:[%s605_s2 + $0x8] sm:$0xff]  ;;  %v36_v10 = vld [vmem:[%s604_s1 + $0x18] sm:$0xff] }
   0x5   :  { %412 = vmatprep.mubr.msk.f32.mxu0 %vm37_vm0, %v33_v2  ;;  %v183_v3 = vld [vmem:[%s605_s2] sm:$0xff]  ;;  %411 = vmatpush3.xpose.msk.msra.mxu0 %vm37_vm0, %v32_v1  ;;  %v212_v9 = vld [vmem:[%s606_s3 + $0x8] sm:$0xff] }
   0x6   :  { %v211_v6 = vld [vmem:[%s606_s3] sm:$0xff]  ;;  %189 = vperm.xlu0 %439, %v183_v3   ;;  %440 = vset.pattern.permute.xlu1 %v467_v5 }
   0x7   :  { %217 = vperm.xlu1 %440, %v211_v6  }
   0x8   :  { %413 = vmatmul.mubr.msk.f32.vlgmr.msra.gmra.mrb[0].mxu0 %vm37_vm0, %v34_v4 }
   0x9   :  { %415 = vmatprep.mubr.msk.f32.mxu0 %vm37_vm0, %v35_v7 }
   0xa   :  { %15 = vsyncpa [#allocation4], 0  ;;  %194 = vperm.xlu0 %439, %v184_v8   ;;  %v185_v11 = vld [vmem:[%s605_s2 + $0x10] sm:$0xff]  ;;  %v186_v12 = vld [vmem:[%s605_s2 + $0x18] sm:$0xff]  ;;  %vm257_vm1 = vcmask 261120   ;;  %vm138_vm2 = vcmask 64512  }
   0xb   :  { %222 = vperm.xlu1 %440, %v212_v9   ;;  %v213_v13 = vld [vmem:[%s606_s3 + $0x10] sm:$0xff]  ;;  %v214_v14 = vld [vmem:[%s606_s3 + $0x18] sm:$0xff]  ;;  %v245_v15 = vld [vmem:[%s608_s5] sm:$0xff]  ;;  %vm356_vm3 = vcmask 58368   ;;  %vm376_vm4 = vcmask 57344  }
   0xc   :  { %416 = vmatmul.mubr.msk.f32.gmra.mrb[2].mxu0 %vm37_vm0, %v36_v10  ;;  %v246_v16 = vld [vmem:[%s608_s5 + $0x8] sm:$0x3]  ;;  %v341_v17 = vld [vmem:[%s609_s6] sm:$0xff] }
   0xd   :  { %v342_v18 = vld [vmem:[%s609_s6 + $0x8] sm:$0x3]  ;;  %v365_v19 = vld [vmem:[#allocation2] sm:$0x1] }
   0xe   :  { %199 = vperm.xlu0 %439, %v185_v11   ;;  %v243_v20 = vld [vmem:[%s607_s4] sm:$0xff] }
   0xf   :  { %204 = vperm.xlu1 %440, %v186_v12   ;;  %426 = vmatprep.mubr.msk.f32.mxu1 %vm257_vm1, %v243_v20 }
  0x12   :  { %227 = vperm.xlu0 %439, %v213_v13  }
  0x13   :  { %232 = vperm.xlu1 %440, %v214_v14  }
  0x16   :  { %249 = vperm.xlu0 %439, %v245_v15  }
  0x17   :  { %254 = vperm.xlu1 %440, %v246_v16  }
  0x1a   :  { %345 = vperm.xlu0 %439, %v341_v17  }
  0x1b   :  { %350 = vperm.xlu1 %440, %v342_v18  }
  0x1e   :  { %368 = vperm.xlu0 %439, %v365_v19  }
  0x85   :  { %v190_v63 = vpop.permute.xlu0 %189 }
  0x86   :  { %v218_v0 = vpop.permute.xlu1 %217 }
  0x89   :  { %v195_v2 = vpop.permute.xlu0 %194 }
  0x8a   :  { %v223_v3 = vpop.permute.xlu1 %222 }
  0x8d   :  { %v200_v4 = vpop.permute.xlu0 %199 }
  0x8e   :  { %v205_v5 = vpop.permute.xlu1 %204 }
  0x91   :  { %v228_v15 = vpop.permute.xlu0 %227 }
  0x92   :  { %v233_v16 = vpop.permute.xlu1 %232 }
  0xdb   :  { %v414_v21 = vpop.f32.mrb[0].mxu0 }
  0xdc   :  { %v140_v22 = vsel %vm138_vm2, %v414_v21, 0.0  ;;  %v153_v23 = vmul.f32 %v414_v21, %v414_v21  ;;  %v119_v24 = vpop.f32.mrb[1].mxu0 }
  0xdd   :  { %v139_v25 = vsel %vm138_vm2, %v119_v24, 0.0  ;;  %v152_v26 = vmul.f32 %v119_v24, %v119_v24 }
  0xde   :  { %v157_v27 = vsel %vm138_vm2, %v153_v23, 0.0  ;;  %v141_v28 = vadd.f32 %v140_v22, %v139_v25 }
  0xdf   :  { %v156_v29 = vsel %vm138_vm2, %v152_v26, 0.0  ;;  %v417_v30 = vpop.f32.mrb[2].mxu0 }
  0xe0   :  { %v158_v31 = vadd.f32 %v157_v27, %v156_v29  ;;  %v129_v32 = vpop.f32.mrb[3].mxu0  ;;  %v155_v33 = vmul.f32 %v417_v30, %v417_v30  ;;  %v144_v37 = vsel %vm138_vm2, %v417_v30, 0.0  ;;  %v244_v27 = vld [vmem:[%s607_s4 + $0x8] sm:$0x3]  ;;  %v250_v29 = vpop.permute.xlu0 %249  ;;  %s468_s4 = smov [#allocation3]  }
  0xe1   :  { %v142_v34 = vsel %vm138_vm2, %v129_v32, 0.0  ;;  %v154_v35 = vmul.f32 %v129_v32, %v129_v32  ;;  %s384_s14 = sshll.u32 %s468_s4, 4  ;;  %s385_s14 = int_to_ptr.vmem [resolvable:$true] %s384_s14 }
  0xe2   :  { %v143_v36 = vadd.f32 %v142_v34, %v141_v28  ;;  %v161_v41 = vsel %vm138_vm2, %v155_v33, 0.0  ;;  %v255_v28 = vpop.permute.xlu1 %254  ;;  %s443_s15 = scalar_lea.vmem %s385_s14, 16  ;;  %s447_s16 = scalar_lea.vmem %s385_s14, 32 }
  0xe3   :  { %v159_v38 = vsel %vm138_vm2, %v154_v35, 0.0  ;;  %p444_p0 = scmp.ne.s32.totalorder %s385_s14, %s443_s15  ;;  %p448_p1 = scmp.lt.s32.totalorder %s385_s14, %s385_s14 }
  0xe4   :  { %v145_v39 = vadd.f32 %v144_v37, %v143_v36  ;;  %v160_v40 = vadd.f32 %v159_v38, %v158_v31  ;;  %v346_v37 = vpop.permute.xlu0 %345  ;;  %p449_p2 = scmp.lt.s32.totalorder %s447_s16, %s443_s15 }
  0xe6   :  { %v146_v42 = vrot.slane %v145_v39, 4  ;;  %v162_v43 = vadd.f32 %v161_v41, %v160_v40  ;;  %v351_v35 = vpop.permute.xlu1 %350  ;;  %p450_p3 = por %p449_p2, %p448_p1 }
  0xe8   :  { %v147_v44 = vadd.f32 %v146_v42, %v145_v39  ;;  %v163_v45 = vrot.slane %v162_v43, 4  ;;  %v371_v42 = vlaneseq  ;;  %p451_p4 = pnand %p450_p3, %p444_p0 }
  0xea   :  { %v148_v46 = vrot.slane %v147_v44, 2  ;;  %v164_v47 = vadd.f32 %v163_v45, %v162_v43  ;;  %v372_v45 = vshrl.u32 %v371_v42, 7 }
  0xec   :  { %v149_v48 = vadd.f32 %v148_v46, %v147_v44  ;;  %v165_v49 = vrot.slane %v164_v47, 2 }
  0xee   :  { %v150_v50 = vrot.slane %v149_v48, 1  ;;  %v166_v51 = vadd.f32 %v165_v49, %v164_v47 }
  0xf0   :  { %v151_v52 = vadd.f32 %v150_v50, %v149_v48  ;;  %v167_v53 = vrot.slane %v166_v51, 1  ;;  %v373_v48 = vsub.s32 0, %v372_v45  ;;  %v369_v50 = vpop.permute.xlu0 %368 }
  0xf2   :  { %v168_v54 = vadd.f32 %v167_v53, %v166_v51  ;;  %v169_v55 = vmul.f32 0.03125, %v151_v52  ;;  %v374_v52 = vrot.slane %v369_v50, %v373_v48 }
  0xf4   :  { %v170_v56 = vmul.f32 0.03125, %v168_v54  ;;  %v171_v57 = vmul.f32 %v169_v55, %v169_v55  ;;  %v177_v58 = vsub.f32 %v129_v32, %v169_v55  ;;  %v175_v59 = vsub.f32 %v119_v24, %v169_v55 }
  0xf5   :  { %v176_v60 = vsub.f32 %v414_v21, %v169_v55  ;;  %v178_v61 = vsub.f32 %v417_v30, %v169_v55 }
  0xf6   :  { %v172_v62 = vsub.f32 %v170_v56, %v171_v57 }
  0xf8   :  { %v173_v1 = vadd.f32 1e-05, %v172_v62 }
  0xfa   :  { %441 = vrsqrt.f32 %v173_v1 }
 0x104   :  { %v442_v6 = vpop.eup %441 }
 0x105   :  { %v179_v7 = vmul.f32 %v442_v6, %v175_v59  ;;  %v180_v8 = vmul.f32 %v442_v6, %v176_v60  ;;  %v181_v9 = vmul.f32 %v442_v6, %v177_v58  ;;  %v182_v10 = vmul.f32 %v442_v6, %v178_v61 }
 0x107   :  { %v207_v11 = vmul.f32 %v190_v63, %v179_v7  ;;  %v208_v12 = vmul.f32 %v195_v2, %v180_v8  ;;  %v209_v13 = vmul.f32 %v200_v4, %v181_v9  ;;  %v210_v14 = vmul.f32 %v205_v5, %v182_v10 }
 0x109   :  { %v235_v17 = vadd.f32 %v218_v0, %v207_v11  ;;  %v236_v18 = vadd.f32 %v223_v3, %v208_v12  ;;  %v237_v19 = vadd.f32 %v228_v15, %v209_v13  ;;  %v238_v20 = vadd.f32 %v233_v16, %v210_v14 }
 0x10b   :  { %v239_v21 = vmax.f32 %v235_v17, 0.0  ;;  %v240_v22 = vmax.f32 %v236_v18, 0.0  ;;  %v241_v23 = vmax.f32 %v237_v19, 0.0  ;;  %v242_v24 = vmax.f32 %v238_v20, 0.0 }
 0x10d   :  { %v433_v25 = vpack.c.bf16 %v242_v24, %v241_v23  ;;  %v429_v26 = vpack.c.bf16 %v240_v22, %v239_v21 }
 0x10f   :  { %430 = vmatprep.subr.bf16.mxu1 %v429_v26 }
 0x110   :  { %432 = vmatpush3.bf16.msra.mxu1 %v429_v26 }
 0x111   :  { %434 = vmatprep.subr.bf16.mxu1 %v433_v25 }
 0x114   :  { %436 = vmatpush3.bf16.msra.mxu1 %v433_v25 }
 0x117   :  { %427 = vmatmul.mubr.msk.f32.vlgmr.msra.gmra.mrb[0].mxu1 %vm257_vm1, %v244_v27 }
 0x1ea   :  { %v428_v30 = vpop.f32.mrb[0].mxu1 }
 0x1eb   :  { %v336_v31 = vadd.f32 %v428_v30, %v255_v28  ;;  %v330_v32 = vpop.f32.mrb[1].mxu1 }
 0x1ec   :  { %v331_v33 = vadd.f32 %v330_v32, %v250_v29 }
 0x1ed   :  { %v340_v34 = vmax.f32 %v336_v31, 0.0 }
 0x1ee   :  { %v339_v36 = vmax.f32 %v331_v33, 0.0 }
 0x1ef   :  { %v354_v38 = vmul.f32 %v351_v35, %v340_v34 }
 0x1f0   :  { %v353_v39 = vmul.f32 %v346_v37, %v339_v36 }
 0x1f1   :  { %v357_v40 = vsel %vm356_vm3, %v354_v38, 0.0 }
 0x1f2   :  { %v355_v41 = vsel %vm138_vm2, %v353_v39, 0.0 }
 0x1f3   :  { %v358_v43 = vadd.f32 %v357_v40, %v355_v41 }
 0x1f5   :  { %v359_v44 = vrot.slane %v358_v43, 4 }
 0x1f7   :  { %v360_v46 = vadd.f32 %v359_v44, %v358_v43 }
 0x1f9   :  { %v361_v47 = vrot.slane %v360_v46, 2 }
 0x1fb   :  { %v362_v49 = vadd.f32 %v361_v47, %v360_v46 }
 0x1fd   :  { %v363_v51 = vrot.slane %v362_v49, 1 }
 0x1ff   :  { %v364_v53 = vadd.f32 %v363_v51, %v362_v49 }
 0x201   :  { %v375_v54 = vadd.f32 %v374_v52, %v364_v53 }
 0x203   :  { %377 = vst.msk [vmem:[#allocation3] sm:$0x1] %vm376_vm4, %v375_v54 }
 0x204   :  { %454 = shalt.err (!%p451_p4)
}
 0x205   :  { %s455_s19 = scalar_lea.hbm %s611_s8, 16 }
 0x206   :  { %p456_p5 = scmp.ne.s32.totalorder %s611_s8, %s455_s19  ;;  %p459_p6 = scmp.lt.u32.totalorder %s455_s19, %s611_s8 }
 0x208   :  { %p461_p7 = pnand %p459_p6, %p456_p5 }
 0x20a   :  { %464 = shalt.err (!%p461_p7)
}
 0x20b   :  { %387 = dma.vmem_to_hbm [thread:$0]  %s385_s14, 16, %s611_s8, [#allocation4]  }
 0x20c   :  { %465 = dma.done.wait [#allocation4], 16  }
 0x20d   :  { %466 = vsyncadd [#allocation4], 4294967280 }
 0x20e   :  { %391 = vsyncpa [#allocation4], 1 }

</bundles_post_ra>
